<compile_context>
chip_gen: v6e
topology: v6e:2x2x1
jax: 0.10.0
libtpu: 0.0.40
codegen_flags: <defaults>
</compile_context>

<pallas_src>
import dataclasses
import math
from typing import Any, Optional

import jax
import jax.numpy as jnp
from jax.experimental import pallas as pl
from jax.experimental.pallas import tpu as pltpu


_LANE = 128
_VMEM_BUDGET = 26 * 1024 * 1024  # pipeline-buffer budget, fits 32 MiB scoped VMEM


def _round_up(a: int, b: int) -> int:
    return ((a + b - 1) // b) * b


def _make_kernel(has_bias: bool, acc_in_out: bool):
    if acc_in_out:
        # f32 output: accumulate directly into the resident output block.
        def kernel(*refs):
            if has_bias:
                x_ref, wt_ref, b_ref, o_ref = refs
            else:
                x_ref, wt_ref, o_ref = refs
                b_ref = None

            k = pl.program_id(2)

            @pl.when(k == 0)
            def _():
                if has_bias:
                    # bias added exactly once, as the accumulator init
                    o_ref[...] = jnp.broadcast_to(b_ref[...], o_ref.shape)
                else:
                    o_ref[...] = jnp.zeros_like(o_ref)

            o_ref[...] += jnp.dot(
                x_ref[...], wt_ref[...], preferred_element_type=jnp.float32
            )
    else:
        # non-f32 output: f32 VMEM scratch accumulator + cast epilogue.
        def kernel(*refs):
            if has_bias:
                x_ref, wt_ref, b_ref, o_ref, acc_ref = refs
            else:
                x_ref, wt_ref, o_ref, acc_ref = refs
                b_ref = None

            k = pl.program_id(2)

            @pl.when(k == 0)
            def _():
                acc_ref[...] = jnp.zeros_like(acc_ref)

            acc_ref[...] += jnp.dot(
                x_ref[...], wt_ref[...], preferred_element_type=jnp.float32
            )

            @pl.when(k == pl.num_programs(2) - 1)
            def _():
                acc = acc_ref[...]
                if has_bias:
                    acc = acc + b_ref[...]  # (1, tn) broadcast, f32
                o_ref[...] = acc.astype(o_ref.dtype)

    return kernel


def _select_tiles(batch_hint, K, N, operand_dtype, *, tm=512, tn=512, tk=1024):
    sub = 16 if jnp.dtype(operand_dtype) == jnp.dtype(jnp.bfloat16) else 8
    op_bytes = jnp.dtype(operand_dtype).itemsize

    K_aligned = _round_up(K, _LANE)
    N_aligned = _round_up(N, _LANE)
    M_aligned = _round_up(max(batch_hint, 1), sub)

    # Small-batch / inference-like: weight-bandwidth bound — single K step,
    # wide N tiles (fewer grid steps).
    if batch_hint <= 64:
        tk = K_aligned
        tn = max(tn, 512)

    tm = min(tm, M_aligned)
    tn = min(tn, N_aligned)
    tk = min(tk, K_aligned)

    # v7x megacore: if the M axis has only one block, make sure the N axis has
    # at least two blocks so both TensorCores get work.
    if M_aligned <= tm and N_aligned >= 2 * _LANE:
        tn = min(tn, _round_up((N_aligned + 1) // 2, _LANE))

    # VMEM budget: double-buffered inputs + double-buffered output + worst-case
    # f32 accumulator + bias.
    def vmem(tm_, tn_, tk_):
        return (
            2 * (tm_ * tk_ + tk_ * tn_) * op_bytes
            + 2 * tm_ * tn_ * 4
            + tm_ * tn_ * 4
            + 2 * tn_ * 4
        )

    while vmem(tm, tn, tk) > _VMEM_BUDGET:
        if tk > 512:
            tk = max(512, _round_up(tk // 2, _LANE))
        elif tn > 256:
            tn = max(256, _round_up(tn // 2, _LANE))
        elif tm > 256:
            tm = max(256, _round_up(tm // 2, sub))
        else:
            break

    return tm, tn, tk


@dataclasses.dataclass
class FALinearParams:
    w_t: Any                 # (Kp, Np) pre-transposed, padded, operand dtype
    bias2: Optional[Any]     # (1, Np) float32, or None
    N: int
    K: int
    tm: int
    tn: int
    tk: int
    operand_dtype: Any


def prepare_fa_linear(weight, bias=None, *, batch_hint=512,
                      operand_dtype=jnp.bfloat16, tm=512, tn=512, tk=1024):
    """One-time weight prep: transpose, cast to operand dtype, pad to tiles."""
    N, K = weight.shape
    tm, tn, tk = _select_tiles(batch_hint, K, N, operand_dtype,
                               tm=tm, tn=tn, tk=tk)
    Kp, Np = _round_up(K, tk), _round_up(N, tn)

    w_t = weight.T.astype(operand_dtype)          # (K, N) -> MXU-ready layout
    if (Kp, Np) != (K, N):
        w_t = jnp.pad(w_t, ((0, Kp - K), (0, Np - N)))

    bias2 = None
    if bias is not None:
        bias2 = bias.astype(jnp.float32).reshape(1, N)
        if Np != N:
            bias2 = jnp.pad(bias2, ((0, 0), (0, Np - N)))

    return FALinearParams(w_t, bias2, N, K, tm, tn, tk, operand_dtype)


def fa_linear_from_prepared(x, params: FALinearParams):
    """Fast path: y = x @ W^T + b with pre-prepared (transposed/padded) weight."""
    B, K = x.shape
    assert K == params.K, (K, params.K)
    out_dtype = x.dtype
    op_dtype = params.operand_dtype
    sub = 16 if jnp.dtype(op_dtype) == jnp.dtype(jnp.bfloat16) else 8

    tn, tk = params.tn, params.tk
    tm = min(params.tm, _round_up(B, sub))
    Kp, Np = params.w_t.shape
    Mp = _round_up(B, tm)

    x = x.astype(op_dtype)
    if (Mp, Kp) != (B, K):
        x = jnp.pad(x, ((0, Mp - B), (0, Kp - K)))

    has_bias = params.bias2 is not None
    acc_in_out = jnp.dtype(out_dtype) == jnp.dtype(jnp.float32)

    args = [x, params.w_t]
    in_specs = [
        pl.BlockSpec((tm, tk), lambda i, j, k: (i, k)),
        pl.BlockSpec((tk, tn), lambda i, j, k: (k, j)),
    ]
    bias_bytes = 0
    if has_bias:
        args.append(params.bias2)
        in_specs.append(pl.BlockSpec((1, tn), lambda i, j, k: (0, j)))
        bias_bytes = int(params.bias2.size) * 4

    grid = (Mp // tm, Np // tn, Kp // tk)
    scratch = [] if acc_in_out else [pltpu.VMEM((tm, tn), jnp.float32)]

    cost = pl.CostEstimate(
        flops=2 * B * params.N * K,
        transcendentals=0,
        bytes_accessed=(
            int(x.size) * x.dtype.itemsize
            + int(params.w_t.size) * params.w_t.dtype.itemsize
            + bias_bytes
            + Mp * Np * jnp.dtype(out_dtype).itemsize
        ),
    )

    out = pl.pallas_call(
        _make_kernel(has_bias, acc_in_out),
        out_shape=jax.ShapeDtypeStruct((Mp, Np), out_dtype),
        grid_spec=pltpu.PrefetchScalarGridSpec(
            num_scalar_prefetch=0,
            grid=grid,
            in_specs=in_specs,
            out_specs=pl.BlockSpec((tm, tn), lambda i, j, k: (i, j)),
            scratch_shapes=scratch,
        ),
        compiler_params=pltpu.CompilerParams(
            dimension_semantics=("parallel", "parallel", "arbitrary"),
            vmem_limit_bytes=32 * 1024 * 1024,
        ),
        cost_estimate=cost,
    )(*args)

    if (Mp, Np) != (B, params.N):
        out = out[:B, :params.N]
    return out


def fa_linear(x, weight, weight_fb, bias=None, *, operand_dtype=None,
              tm=512, tn=512, tk=1024):
    """Pallas TPU implementation of FALinear.forward (weight_fb unused in fwd).

    Convenience wrapper that prepares the weight per call. For the hot path,
    call prepare_fa_linear() once and fa_linear_from_prepared() per step.
    """
    del weight_fb  # consumed only by the custom backward in the PyTorch module
    if operand_dtype is None:
        operand_dtype = (jnp.bfloat16
                         if x.dtype in (jnp.float32, jnp.bfloat16)
                         else x.dtype)
    params = prepare_fa_linear(weight, bias, batch_hint=x.shape[0],
                               operand_dtype=operand_dtype, tm=tm, tn=tn, tk=tk)
    return fa_linear_from_prepared(x, params)


def init_fa_linear_params(key, in_features, out_features, use_bias=True,
                          dtype=jnp.float32):
    """Deterministic init mirroring FALinear.reset_parameters."""
    k_w, k_wfb, k_b = jax.random.split(key, 3)
    # kaiming_uniform_(a=sqrt(5)) -> bound = sqrt(6 / ((1 + a^2) * fan_in))
    #                              = sqrt(1 / fan_in)
    fan_in = in_features
    bound_w = math.sqrt(1.0 / fan_in)
    weight = jax.random.uniform(k_w, (out_features, in_features),
                                minval=-bound_w, maxval=bound_w, dtype=dtype)
    weight_fb = jax.random.uniform(k_wfb, (out_features, in_features),
                                   minval=-bound_w, maxval=bound_w, dtype=dtype)
    if use_bias:
        bound_b = 1.0 / math.sqrt(fan_in)
        bias = jax.random.uniform(k_b, (out_features,),
                                  minval=-bound_b, maxval=bound_b, dtype=dtype)
    else:
        bias = None
    return weight, weight_fb, bias


if __name__ == "__main__":
    key = jax.random.PRNGKey(0)
    k_x, k_p = jax.random.split(key)

    batch, in_features, out_features = 8, 32, 16
    x = jax.random.normal(k_x, (batch, in_features), dtype=jnp.float32)
    weight, weight_fb, bias = init_fa_linear_params(
        k_p, in_features, out_features, use_bias=True)

    # References.
    ref_f32 = x @ weight.T + bias[None, :]
    xb = x.astype(jnp.bfloat16).astype(jnp.float32)
    wb = weight.astype(jnp.bfloat16).astype(jnp.float32)
    ref_bf16 = xb @ wb.T + bias[None, :]

    # 1) Default path: bf16 operands, f32 accumulate, f32 output (acc-in-out).
    out = jax.block_until_ready(fa_linear(x, weight, weight_fb, bias))
    assert out.shape == (batch, out_features)
    assert out.dtype == x.dtype
    assert jnp.allclose(out, ref_bf16, atol=1e-4, rtol=1e-4)
    assert jnp.allclose(out, ref_f32, atol=5e-2, rtol=5e-2)

    # 2) Prepared-weight fast path matches the convenience wrapper.
    prep = prepare_fa_linear(weight, bias, batch_hint=batch)
    out_prep = jax.block_until_ready(fa_linear_from_prepared(x, prep))
    assert jnp.allclose(out_prep, out, atol=1e-6, rtol=1e-6)

    # 3) Exact f32-operand path.
    out_f32 = jax.block_until_ready(
        fa_linear(x, weight, weight_fb, bias, operand_dtype=jnp.float32))
    assert jnp.allclose(out_f32, ref_f32, atol=1e-5, rtol=1e-5)

    # 4) bias=None path.
    out_nb = jax.block_until_ready(
        fa_linear(x, weight, weight_fb, None, operand_dtype=jnp.float32))
    assert jnp.allclose(out_nb, x @ weight.T, atol=1e-5, rtol=1e-5)

    # 5) bf16 output path (exercises the scratch-accumulator kernel variant).
    out_bf = jax.block_until_ready(
        fa_linear(x.astype(jnp.bfloat16), weight, weight_fb, bias))
    assert out_bf.dtype == jnp.bfloat16
    assert jnp.allclose(out_bf.astype(jnp.float32), ref_bf16,
                        atol=3e-2, rtol=3e-2)

    print("KERNEL_OK")
</pallas_src>

<mosaic_0001>
module attributes {stable_mosaic.version = 11 : i64} {
  func.func @kernel(%arg0: i32, %arg1: i32, %arg2: i32, %arg3: memref<16x128xbf16, #tpu.memory_space<vmem>>, %arg4: memref<128x128xbf16, #tpu.memory_space<vmem>>, %arg5: memref<1x128xf32, #tpu.memory_space<vmem>>, %arg6: memref<16x128xf32, #tpu.memory_space<vmem>>) attributes {dimension_semantics = [#tpu.dimension_semantics<parallel>, #tpu.dimension_semantics<parallel>, #tpu.dimension_semantics<arbitrary>], iteration_bounds = array<i64: 1, 1, 1>, scalar_prefetch = 0 : i64, scratch_operands = 0 : i64, tpu.core_type = #tpu.core_type<tc>, window_params = [{transform_indices = @transform_0, window_bounds = array<i64: 16, 128>}, {transform_indices = @transform_1, window_bounds = array<i64: 128, 128>}, {transform_indices = @transform_2, window_bounds = array<i64: 1, 128>}, {transform_indices = @transform_3, window_bounds = array<i64: 16, 128>}]} {
    %c0_i32 = arith.constant 0 : i32
    %0 = arith.cmpi eq, %arg2, %c0_i32 : i32
    %1 = arith.extui %0 : i1 to i32
    %c0_i32_0 = arith.constant 0 : i32
    %2 = arith.cmpi ne, %1, %c0_i32_0 : i32
    scf.if %2 {
      %c0_8 = arith.constant 0 : index
      %c0_9 = arith.constant 0 : index
      %9 = vector.load %arg5[%c0_8, %c0_9] : memref<1x128xf32, #tpu.memory_space<vmem>>, vector<1x128xf32>
      %10 = vector.shape_cast %9 : vector<1x128xf32> to vector<1x128xf32>
      %11 = vector.broadcast %10 : vector<1x128xf32> to vector<16x128xf32>
      %c0_10 = arith.constant 0 : index
      %c0_11 = arith.constant 0 : index
      %12 = vector.load %arg6[%c0_10, %c0_11] : memref<16x128xf32, #tpu.memory_space<vmem>>, vector<16x128xf32>
      tpu.vector_store %arg6[%c0_10, %c0_11], %11 {strides = array<i32>} : memref<16x128xf32, #tpu.memory_space<vmem>>, vector<16x128xf32>,
    } else {
    }
    %c0 = arith.constant 0 : index
    %c0_1 = arith.constant 0 : index
    %3 = vector.load %arg6[%c0, %c0_1] : memref<16x128xf32, #tpu.memory_space<vmem>>, vector<16x128xf32>
    %c0_2 = arith.constant 0 : index
    %c0_3 = arith.constant 0 : index
    %4 = vector.load %arg3[%c0_2, %c0_3] : memref<16x128xbf16, #tpu.memory_space<vmem>>, vector<16x128xbf16>
    %c0_4 = arith.constant 0 : index
    %c0_5 = arith.constant 0 : index
    %5 = vector.load %arg4[%c0_4, %c0_5] : memref<128x128xbf16, #tpu.memory_space<vmem>>, vector<128x128xbf16>
    %cst = arith.constant dense<0.000000e+00> : vector<16x128xf32>
    %6 = tpu.matmul %4, %5, %cst {dimension_numbers = #tpu.dot_dimension_numbers<[1], [0], [0], [1], [0, 0, 1, 1], [], []>} : vector<16x128xbf16>, vector<128x128xbf16>, vector<16x128xf32> -> vector<16x128xf32>
    %7 = arith.addf %3, %6 : vector<16x128xf32>
    %c0_6 = arith.constant 0 : index
    %c0_7 = arith.constant 0 : index
    %8 = vector.load %arg6[%c0_6, %c0_7] : memref<16x128xf32, #tpu.memory_space<vmem>>, vector<16x128xf32>
    tpu.vector_store %arg6[%c0_6, %c0_7], %7 {strides = array<i32>} : memref<16x128xf32, #tpu.memory_space<vmem>>, vector<16x128xf32>,
    return
  }
  func.func @transform_0(%arg0: i32, %arg1: i32, %arg2: i32) -> (i32, i32) {
    %c0_i32 = arith.constant 0 : i32
    return %arg0, %arg2 : i32, i32
  }
  func.func @transform_1(%arg0: i32, %arg1: i32, %arg2: i32) -> (i32, i32) {
    %c0_i32 = arith.constant 0 : i32
    return %arg2, %arg1 : i32, i32
  }
  func.func @transform_2(%arg0: i32, %arg1: i32, %arg2: i32) -> (i32, i32) {
    %c0_i32 = arith.constant 0 : i32
    %c0_i32_0 = arith.constant 0 : i32
    return %c0_i32, %arg1 : i32, i32
  }
  func.func @transform_3(%arg0: i32, %arg1: i32, %arg2: i32) -> (i32, i32) {
    %c0_i32 = arith.constant 0 : i32
    return %arg0, %arg1 : i32, i32
  }
}

</mosaic_0001>

<bundles_post_ra>
// kernel: tpu_custom_call.1
= control target key start
LH: loop header
LB: loop body
LE: loop exit
PB: predicated region body
PF: predicated region fallthrough
CT: control target
= control target key end

     0   :  { %8 = vsyncpa [#allocation3], 0  ;;  %s358_s0 = inlined_call_operand.hbm [shape: bf16[16,128], index: 0, kind: input, shape index: {}]   ;;  %s359_s1 = inlined_call_operand.hbm [shape: bf16[128,128], index: 1, kind: input, shape index: {}]   ;;  %s360_s2 = inlined_call_operand.vmem [shape: f32[1,128], index: 2, kind: input, shape index: {}]   ;;  %s361_s3 = inlined_call_operand.hbm [shape: f32[16,128], index: 3, kind: output, shape index: {}]  }
   0x1   :  { %9 = vsyncpa [#allocation6], 0 }
   0x2   :  { %10 = vsyncpa [#allocation4], 0  ;;  %s317_s12 = smov [#allocation2]  }
   0x3   :  { %s16_s13 = sshll.u32 %s317_s12, 4  ;;  %s17_s13 = int_to_ptr.vmem [resolvable:$true] %s16_s13 }
   0x4   :  { %s259_s14 = scalar_lea.vmem %s17_s13, 128  ;;  %p264_p1 = scmp.lt.s32.totalorder %s17_s13, %s17_s13 }
   0x5   :  { %p260_p0 = scmp.ne.s32.totalorder %s17_s13, %s259_s14  ;;  %p265_p2 = scmp.lt.s32.totalorder %s259_s14, %s259_s14 }
   0x7   :  { %p266_p3 = por %p265_p2, %p264_p1 }
   0x9   :  { %p267_p4 = pnand %p266_p3, %p260_p0 }
   0xb   :  { %270 = shalt.err (!%p267_p4)
}
   0xc   :  { %s318_s15 = smov 64   ;;  %s319_s16 = smov 4  }
   0xd   :  { %22 = dma.hbm_to_vmem [thread:$0]  %s358_s0, 128, %s17_s13, [#allocation3], %s318_s15, %s318_s15, %s319_s16  }
   0xe   :  { %s320_s19 = smov [#allocation5]  }
   0xf   :  { %s28_s20 = sshll.u32 %s320_s19, 4  ;;  %s29_s20 = int_to_ptr.vmem [resolvable:$true] %s28_s20 }
  0x10   :  { %s279_s21 = scalar_lea.vmem %s29_s20, 1024  ;;  %p284_p6 = scmp.lt.s32.totalorder %s29_s20, %s29_s20 }
  0x11   :  { %p280_p5 = scmp.ne.s32.totalorder %s29_s20, %s279_s21  ;;  %p285_p7 = scmp.lt.s32.totalorder %s279_s21, %s279_s21 }
  0x13   :  { %p286_p8 = por %p285_p7, %p284_p6 }
  0x15   :  { %p287_p9 = pnand %p286_p8, %p280_p5 }
  0x17   :  { %290 = shalt.err (!%p287_p9)
}
  0x18   :  { %34 = dma.hbm_to_vmem [thread:$0]  %s359_s1, 1024, %s29_s20, [#allocation6], %s318_s15, %s318_s15, %s319_s16  }
  0x19   :  { %311 = dma.done.wait [#allocation3], 128  }
  0x1a   :  { %312 = vsyncadd [#allocation3], 4294967168 }
  0x1b   :  { %313 = dma.done.wait [#allocation6], 1024  }
  0x1c   :  { %314 = vsyncadd [#allocation6], 4294966272  ;;  %v321_v0 = vmov 0.0   ;;  %vm322_vm0 = vmmov 0   ;;  %v242_v1 = vld [vmem:[#allocation5 + $0x38] sm:$0xff]   ;;  %v243_v2 = vld [vmem:[#allocation5 + $0x30] sm:$0xff]  }
  0x1d   :  { %213 = vmatprep.subr.bf16.mxu0 %v321_v0  ;;  %229 = vmatprep.mubr.msk.bf16.mxu0 %vm322_vm0, %v321_v0  ;;  %v244_v3 = vld [vmem:[#allocation5 + $0x28] sm:$0xff]   ;;  %v245_v4 = vld [vmem:[#allocation5 + $0x20] sm:$0xff]   ;;  %v246_v5 = vld [vmem:[#allocation5 + $0x18] sm:$0xff]   ;;  %s323_s24 = smov [#allocation7]  }
  0x1e   :  { %214 = vmatpush3.bf16.msra.mxu0 %v242_v1  ;;  %v247_v6 = vld [vmem:[#allocation5 + $0x10] sm:$0xff]   ;;  %v248_v7 = vld [vmem:[#allocation5 + $0x8] sm:$0xff]   ;;  %v249_v8 = vld [vmem:[#allocation5] sm:$0xff]   ;;  %s181_s25 = sshll.u32 %s323_s24, 4  ;;  %s182_s25 = int_to_ptr.vmem [resolvable:$true] %s181_s25 }
  0x1f   :  { %215 = vmatprep.subr.bf16.mxu0 %v321_v0  ;;  %v250_v9 = vld [vmem:[#allocation2] sm:$0xff]   ;;  %s291_s26 = scalar_lea.vmem %s182_s25, 256  ;;  %p296_p11 = scmp.lt.s32.totalorder %s182_s25, %s182_s25 }
  0x20   :  { %v194_v10 = vld [vmem:[%s360_s2] ss:$0 sm:$0xff]  ;;  %p292_p10 = scmp.ne.s32.totalorder %s182_s25, %s291_s26  ;;  %p297_p12 = scmp.lt.s32.totalorder %s291_s26, %s291_s26 }
  0x22   :  { %216 = vmatpush3.bf16.msra.mxu0 %v243_v2  ;;  %p298_p13 = por %p297_p12, %p296_p11 }
  0x23   :  { %217 = vmatprep.subr.bf16.mxu0 %v321_v0 }
  0x24   :  { %p299_p0 = pnand %p298_p13, %p292_p10 }
  0x26   :  { %218 = vmatpush3.bf16.msra.mxu0 %v244_v3 }
  0x27   :  { %219 = vmatprep.subr.bf16.mxu0 %v321_v0 }
  0x2a   :  { %220 = vmatpush3.bf16.msra.mxu0 %v245_v4 }
  0x2b   :  { %221 = vmatprep.subr.bf16.mxu0 %v321_v0 }
  0x2e   :  { %222 = vmatpush3.bf16.msra.mxu0 %v246_v5 }
  0x2f   :  { %223 = vmatprep.subr.bf16.mxu0 %v321_v0 }
  0x32   :  { %224 = vmatpush3.bf16.msra.mxu0 %v247_v6 }
  0x33   :  { %225 = vmatprep.subr.bf16.mxu0 %v321_v0 }
  0x36   :  { %226 = vmatpush3.bf16.msra.mxu0 %v248_v7 }
  0x37   :  { %227 = vmatprep.subr.bf16.mxu0 %v321_v0 }
  0x3a   :  { %228 = vmatpush3.bf16.msra.mxu0 %v249_v8 }
  0x3d   :  { %230 = vmatmul.mubr.bf16.vlgmr.msra.gmra.mxu0 %v250_v9 }
  0xfd   :  { %v165_v11 = vpop.f32.mrf.mxu0 }
  0xfe   :  { %v172_v12 = vadd.f32 %v194_v10, %v165_v11 }
  0xff   :  { %v231_v13 = vpop.f32.mrf.mxu0 }
 0x100   :  { %174 = vst [vmem:[#allocation7] sm:$0xff] %v172_v12 }
 0x101   :  { %v168_v14 = vpop.f32.mrf.mxu0 }
 0x102   :  { %v173_v15 = vadd.f32 %v194_v10, %v168_v14 }
 0x103   :  { %v232_v16 = vpop.f32.mrf.mxu0 }
 0x104   :  { %175 = vst [vmem:[#allocation7 + $0x8] sm:$0xff] %v173_v15 }
 0x105   :  { %302 = shalt.err (!%p299_p0)
}
 0x106   :  { %s324_s27 = smov 128   ;;  %s325_s2 = smov 8  }
 0x107   :  { %187 = dma.vmem_to_hbm [thread:$0]  %s182_s25, 256, %s361_s3, [#allocation4], %s324_s27, %s324_s27, %s325_s2  }
 0x108   :  { %315 = dma.done.wait [#allocation4], 256  }
 0x109   :  { %316 = vsyncadd [#allocation4], 4294967040 }
 0x10a   :  { %191 = vsyncpa [#allocation3], 1 }
 0x10b   :  { %192 = vsyncpa [#allocation6], 1 }
 0x10c   :  { %193 = vsyncpa [#allocation4], 1 }

</bundles_post_ra>
